<compile_context>
chip_gen: v6e
topology: v6e:2x2x1
jax: 0.10.0
libtpu: 0.0.40
codegen_flags: <defaults>
</compile_context>

<pallas_src>
import jax
import jax.numpy as jnp
from jax.experimental import pallas as pl
from jax.experimental.pallas import tpu as pltpu


def _round_up(x: int, m: int) -> int:
    return (x + m - 1) // m * m


def _choose_item_tile(n_pad: int, num_items: int) -> int:
    # Keep the per-grid-step (n_pad, tile) one-hot working set ~<= 2 MiB of f32 so the
    # kernel fits comfortably in scoped VMEM on every TPU generation (v5e/v6e/v7x).
    budget_elems = (2 * 1024 * 1024) // 4
    tile = (budget_elems // max(n_pad, 1)) // 128 * 128
    tile = max(128, min(2048, tile))
    tile = min(tile, _round_up(num_items, 128))
    return tile


# --------------------------------------------------------------------------------------
# Kernels
# --------------------------------------------------------------------------------------
def _scatter_kernel(items_ref, counters_ref, out_ref):
    """Add the per-tile histogram of (masked) item ids to this counter tile."""
    tile_i = counters_ref.shape[1]
    off = pl.program_id(0) * tile_i

    items = items_ref[...]                                   # (N_pad, 1) int32, -1 == dropped
    n = items.shape[0]

    # one-hot over this tile's item-id range; masked / padded entries are -1 and never hit
    ids = jax.lax.broadcasted_iota(jnp.int32, (n, tile_i), 1) + off
    hits = (items == ids).astype(jnp.float32)                # (N_pad, TILE_I)

    # scatter_add_: duplicates accumulate; sublane reduce keeps the result lane-dense
    out_ref[...] = counters_ref[...] + jnp.sum(hits, axis=0, keepdims=True)


def _gather_kernel(items_ref, counters_ref, logits_ref):
    """Accumulate counters[items] contributions from this counter tile (lane-dense out)."""
    t = pl.program_id(0)

    @pl.when(t == 0)
    def _():
        logits_ref[...] = jnp.zeros_like(logits_ref)

    tile_i = counters_ref.shape[0]
    off = t * tile_i

    items = items_ref[...]                                   # (1, N_pad) int32
    n = items.shape[1]

    ids = jax.lax.broadcasted_iota(jnp.int32, (tile_i, n), 0) + off
    hits = ids == items                                      # (TILE_I, N_pad) bool
    vals = counters_ref[...]                                 # (TILE_I, 1) f32

    # each column has at most one hit -> this sum IS the gather for ids inside the tile
    logits_ref[...] += jnp.sum(jnp.where(hits, vals, 0.0), axis=0, keepdims=True)


# --------------------------------------------------------------------------------------
# pallas_call wrappers
# --------------------------------------------------------------------------------------
def _scatter_add(items_scatter_col, counters_row, tile_i):
    n_pad = items_scatter_col.shape[0]
    p = counters_row.shape[1]
    return pl.pallas_call(
        _scatter_kernel,
        out_shape=jax.ShapeDtypeStruct((1, p), jnp.float32),
        grid=(p // tile_i,),
        in_specs=[
            pl.BlockSpec((n_pad, 1), lambda t: (0, 0)),       # resident across tiles
            pl.BlockSpec((1, tile_i), lambda t: (0, t)),      # lane-dense counter tile
        ],
        out_specs=pl.BlockSpec((1, tile_i), lambda t: (0, t)),
        input_output_aliases={1: 0},                          # reuse counters HBM buffer
        compiler_params=pltpu.CompilerParams(
            dimension_semantics=("parallel",)),               # tiles are disjoint
    )(items_scatter_col, counters_row)


def _gather(items_row, counters_col, tile_i):
    n_pad = items_row.shape[1]
    p = counters_col.shape[0]
    return pl.pallas_call(
        _gather_kernel,
        out_shape=jax.ShapeDtypeStruct((1, n_pad), jnp.float32),
        grid=(p // tile_i,),
        in_specs=[
            pl.BlockSpec((1, n_pad), lambda t: (0, 0)),       # resident across tiles
            pl.BlockSpec((tile_i, 1), lambda t: (t, 0)),      # counters along sublanes
        ],
        out_specs=pl.BlockSpec((1, n_pad), lambda t: (0, 0)),  # resident accumulator
        compiler_params=pltpu.CompilerParams(
            dimension_semantics=("arbitrary",)),              # logits accumulates over tiles
    )(items_row, counters_col)


# --------------------------------------------------------------------------------------
# Forward pass
# --------------------------------------------------------------------------------------
def popularity_forward(items, counters, mask=None, training=True):
    """items: int array (any shape); counters: float32 (num_items,).

    Returns (logits with items.shape, updated counters (num_items,)).
    Eval (`training=False`) is a pure gather and never mutates the counters.
    """
    num_items = counters.shape[0]
    item_shape = items.shape
    items_flat = items.reshape(-1).astype(jnp.int32)
    n = items_flat.shape[0]

    n_pad = _round_up(max(n, 1), 128)
    tile_i = _choose_item_tile(n_pad, num_items)
    p = _round_up(num_items, tile_i)

    pad_n = n_pad - n
    items_padded = jnp.pad(items_flat, (0, pad_n))            # pad ids with 0 (sliced off)
    items_row = items_padded.reshape(1, n_pad)                # lane-dense gather indices

    counters_pad = jnp.pad(counters.astype(jnp.float32), (0, p - num_items))

    if training:
        if mask is not None:
            keep = mask.reshape(-1) != 0
        else:
            keep = items_flat > 0
        keep = jnp.pad(keep, (0, pad_n), constant_values=False)
        # fold the mask into the ids: dropped / padded entries become -1 and never
        # match the item-id iota inside the scatter kernel (no mask input, no multiply).
        items_scatter = jnp.where(keep, items_padded, -1).reshape(n_pad, 1)

        new_counters_row = _scatter_add(items_scatter, counters_pad.reshape(1, p), tile_i)
        new_counters_pad = new_counters_row.reshape(p)
        new_counters = new_counters_pad[:num_items]
    else:
        # eval fast path: gather only, no scatter, no counters writeback
        new_counters_pad = counters_pad
        new_counters = counters

    logits_row = _gather(items_row, new_counters_pad.reshape(p, 1), tile_i)
    logits = logits_row.reshape(n_pad)[:n].reshape(item_shape)
    return logits, new_counters


# --------------------------------------------------------------------------------------
# Pure-JAX reference mirroring the PyTorch module
# --------------------------------------------------------------------------------------
def _reference_forward(items, counters, mask=None, training=True):
    counters = counters.astype(jnp.float32)
    if not training:
        return counters[items], counters
    items_flat = items.reshape(-1)
    if mask is not None:
        m = mask.reshape(-1) != 0
    else:
        m = items_flat > 0
    ones = jnp.where(m, 1.0, 0.0)
    new_counters = counters.at[items_flat].add(ones)
    return new_counters[items], new_counters


if __name__ == "__main__":
    num_items = 128
    batch, seq = 2, 8

    key = jax.random.PRNGKey(0)
    items = jax.random.randint(key, (batch, seq), 0, num_items, dtype=jnp.int32)

    # Buffer is registered as zeros in __init__ (deterministic).
    counters = jnp.zeros((num_items,), jnp.float32)

    # --- training step 1 (default mask = items > 0) ---
    logits1, counters1 = popularity_forward(items, counters, training=True)
    logits1 = jax.block_until_ready(logits1)
    ref_logits1, ref_counters1 = _reference_forward(items, counters, training=True)

    # --- training step 2 with an explicit mask ---
    mask = (jax.random.uniform(jax.random.PRNGKey(1), (batch, seq)) > 0.5).astype(jnp.int32)
    logits2, counters2 = popularity_forward(items, counters1, mask=mask, training=True)
    logits2 = jax.block_until_ready(logits2)
    ref_logits2, ref_counters2 = _reference_forward(items, ref_counters1, mask=mask, training=True)

    # --- eval forward (pure gather, no buffer update) ---
    logits_eval, counters_eval = popularity_forward(items, counters2, training=False)
    logits_eval = jax.block_until_ready(logits_eval)
    ref_logits_eval, _ = _reference_forward(items, ref_counters2, training=False)

    assert logits1.shape == items.shape and logits1.dtype == jnp.float32
    assert jnp.allclose(logits1, ref_logits1)
    assert jnp.allclose(counters1, ref_counters1)
    assert jnp.allclose(logits2, ref_logits2)
    assert jnp.allclose(counters2, ref_counters2)
    assert jnp.allclose(logits_eval, ref_logits_eval)
    assert jnp.allclose(counters_eval, counters2)   # eval does not mutate the buffer

    print("KERNEL_OK")
</pallas_src>

<mosaic_0001>
module attributes {stable_mosaic.version = 11 : i64} {
  func.func @_scatter_kernel(%arg0: i32, %arg1: memref<128x1xi32, #tpu.memory_space<vmem>>, %arg2: memref<1x128xf32, #tpu.memory_space<vmem>>, %arg3: memref<1x128xf32, #tpu.memory_space<vmem>>) attributes {dimension_semantics = [#tpu.dimension_semantics<parallel>], iteration_bounds = array<i64: 1>, scalar_prefetch = 0 : i64, scratch_operands = 0 : i64, tpu.core_type = #tpu.core_type<tc>, window_params = [{pipeline_mode = #tpu.pipeline_mode<synchronous>, transform_indices = @transform_0, window_bounds = array<i64: 128, 1>}, {transform_indices = @transform_1, window_bounds = array<i64: 1, 128>}, {transform_indices = @transform_2, window_bounds = array<i64: 1, 128>}]} {
    %c128_i32 = arith.constant 128 : i32
    %0 = arith.muli %arg0, %c128_i32 : i32
    %c0 = arith.constant 0 : index
    %c0_0 = arith.constant 0 : index
    %1 = vector.load %arg1[%c0, %c0_0] : memref<128x1xi32, #tpu.memory_space<vmem>>, vector<128x1xi32>
    %2 = tpu.iota {dimensions = array<i32: 1>} : vector<128x128xi32>
    %3 = vector.broadcast %0 : i32 to vector<128x128xi32>
    %4 = arith.addi %2, %3 : vector<128x128xi32>
    %5 = vector.broadcast %1 : vector<128x1xi32> to vector<128x128xi32>
    %6 = arith.cmpi eq, %5, %4 : vector<128x128xi32>
    %7 = arith.extui %6 : vector<128x128xi1> to vector<128x128xi32>
    %8 = arith.sitofp %7 : vector<128x128xi32> to vector<128x128xf32>
    %c0_1 = arith.constant 0 : index
    %c0_2 = arith.constant 0 : index
    %9 = vector.load %arg2[%c0_1, %c0_2] : memref<1x128xf32, #tpu.memory_space<vmem>>, vector<1x128xf32>
    %cst = arith.constant dense<0.000000e+00> : vector<128xf32>
    %10 = vector.multi_reduction <add>, %8, %cst [0] : vector<128x128xf32> to vector<128xf32>
    %11 = vector.shape_cast %10 : vector<128xf32> to vector<1x128xf32>
    %12 = arith.addf %9, %11 : vector<1x128xf32>
    %c0_3 = arith.constant 0 : index
    %c0_4 = arith.constant 0 : index
    %13 = vector.load %arg3[%c0_3, %c0_4] : memref<1x128xf32, #tpu.memory_space<vmem>>, vector<1x128xf32>
    tpu.vector_store %arg3[%c0_3, %c0_4], %12 {strides = array<i32>} : memref<1x128xf32, #tpu.memory_space<vmem>>, vector<1x128xf32>,
    return
  }
  func.func @transform_0(%arg0: i32) -> (i32, i32) {
    %c0_i32 = arith.constant 0 : i32
    %c0_i32_0 = arith.constant 0 : i32
    %c0_i32_1 = arith.constant 0 : i32
    return %c0_i32, %c0_i32_0 : i32, i32
  }
  func.func @transform_1(%arg0: i32) -> (i32, i32) {
    %c0_i32 = arith.constant 0 : i32
    %c0_i32_0 = arith.constant 0 : i32
    return %c0_i32, %arg0 : i32, i32
  }
  func.func @transform_2(%arg0: i32) -> (i32, i32) {
    %c0_i32 = arith.constant 0 : i32
    %c0_i32_0 = arith.constant 0 : i32
    return %c0_i32, %arg0 : i32, i32
  }
}

</mosaic_0001>

<bundles_post_ra>
// kernel: tpu_custom_call.1
= control target key start
LH: loop header
LB: loop body
LE: loop exit
PB: predicated region body
PF: predicated region fallthrough
CT: control target
= control target key end

     0   :  { %7 = vsyncpa [#allocation3], 0  ;;  %s337_s0 = inlined_call_operand.vmem [shape: s32[128,1], index: 0, kind: input, shape index: {}]   ;;  %s338_s1 = inlined_call_operand.hbm [shape: f32[1,128], index: 1, kind: input, shape index: {}, may-alias: {1,2}]   ;;  %s339_s2 = inlined_call_operand.hbm [shape: f32[1,128], index: 2, kind: output, shape index: {}, may-alias: {1,2}]  }
   0x1   :  { %8 = vsyncpa [#allocation4], 0  ;;  %s246_s9 = smov [#allocation2]  }
   0x2   :  { %s17_s10 = sshll.u32 %s246_s9, 4  ;;  %s18_s10 = int_to_ptr.vmem [resolvable:$true] %s17_s10 }
   0x3   :  { %s210_s11 = scalar_lea.vmem %s18_s10, 16  ;;  %s214_s12 = scalar_lea.vmem %s18_s10, 32 }
   0x4   :  { %p211_p0 = scmp.ne.s32.totalorder %s18_s10, %s210_s11  ;;  %p215_p1 = scmp.lt.s32.totalorder %s18_s10, %s18_s10 }
   0x5   :  { %p216_p2 = scmp.lt.s32.totalorder %s214_s12, %s210_s11 }
   0x7   :  { %p217_p3 = por %p216_p2, %p215_p1 }
   0x9   :  { %p218_p4 = pnand %p217_p3, %p211_p0 }
   0xb   :  { %221 = shalt.err (!%p218_p4)
}
   0xc   :  { %20 = dma.hbm_to_vmem [thread:$0]  %s338_s1, 16, %s18_s10, [#allocation3]  }
   0xd   :  { %242 = dma.done.wait [#allocation3], 16  }
   0xe   :  { %243 = vsyncadd [#allocation3], 4294967280  ;;  %v247_v0 = vmov 0   ;;  %v27_v1 = vld [vmem:[%s337_s0 + $0x10] sm:$0xff]  ;;  %v25_v2 = vld [vmem:[%s337_s0] sm:$0xff]  ;;  %v41_v17 = vlaneseq  ;;  %v248_v23 = vmov 0.0  }
   0xf   :  { %201 = vset.pattern.permute.xlu1 %v247_v0  ;;  %200 = vset.pattern.permute.xlu0 %v247_v0  ;;  %v28_v3 = vld [vmem:[%s337_s0 + $0x18] sm:$0xff]  ;;  %v26_v4 = vld [vmem:[%s337_s0 + $0x8] sm:$0xff]  ;;  %v29_v6 = vld [vmem:[%s337_s0 + $0x20] sm:$0xff] }
  0x10   :  { %52 = vperm.xlu1 %201, %v27_v1   ;;  %46 = vperm.xlu0 %200, %v25_v2   ;;  %v30_v5 = vld [vmem:[%s337_s0 + $0x28] sm:$0xff]  ;;  %v32_v7 = vld [vmem:[%s337_s0 + $0x38] sm:$0xff]  ;;  %v31_v8 = vld [vmem:[%s337_s0 + $0x30] sm:$0xff]  ;;  %v316_v18 = vand.u32 127, %v41_v17 }
  0x11   :  { %v34_v9 = vld [vmem:[%s337_s0 + $0x48] sm:$0xff]  ;;  %v33_v10 = vld [vmem:[%s337_s0 + $0x40] sm:$0xff]  ;;  %v36_v11 = vld [vmem:[%s337_s0 + $0x58] sm:$0xff] }
  0x12   :  { %v35_v12 = vld [vmem:[%s337_s0 + $0x50] sm:$0xff]  ;;  %v38_v13 = vld [vmem:[%s337_s0 + $0x68] sm:$0xff]  ;;  %v37_v14 = vld [vmem:[%s337_s0 + $0x60] sm:$0xff] }
  0x13   :  { %v40_v15 = vld [vmem:[%s337_s0 + $0x78] sm:$0xff]  ;;  %v39_v16 = vld [vmem:[%s337_s0 + $0x70] sm:$0xff]  ;;  %s249_s0 = smov [#allocation5]  }
  0x14   :  { %55 = vperm.xlu1 %201, %v28_v3   ;;  %49 = vperm.xlu0 %200, %v26_v4   ;;  %s171_s18 = sshll.u32 %s249_s0, 4  ;;  %s172_s18 = int_to_ptr.vmem [resolvable:$true] %s171_s18 }
  0x15   :  { %s222_s19 = scalar_lea.vmem %s172_s18, 16  ;;  %s226_s20 = scalar_lea.vmem %s172_s18, 32 }
  0x16   :  { %p223_p5 = scmp.ne.s32.totalorder %s172_s18, %s222_s19  ;;  %p227_p6 = scmp.lt.s32.totalorder %s172_s18, %s172_s18 }
  0x17   :  { %p228_p7 = scmp.lt.s32.totalorder %s226_s20, %s222_s19 }
  0x18   :  { %61 = vperm.xlu1 %201, %v30_v5   ;;  %58 = vperm.xlu0 %200, %v29_v6  }
  0x19   :  { %p229_p8 = por %p228_p7, %p227_p6 }
  0x1b   :  { %p230_p9 = pnand %p229_p8, %p223_p5 }
  0x1c   :  { %67 = vperm.xlu1 %201, %v32_v7   ;;  %64 = vperm.xlu0 %200, %v31_v8   ;;  %v141_v8 = vld [vmem:[#allocation2] sm:$0x1] }
  0x20   :  { %73 = vperm.xlu1 %201, %v34_v9   ;;  %70 = vperm.xlu0 %200, %v33_v10  }
  0x24   :  { %79 = vperm.xlu1 %201, %v36_v11   ;;  %76 = vperm.xlu0 %200, %v35_v12  }
  0x28   :  { %85 = vperm.xlu1 %201, %v38_v13   ;;  %82 = vperm.xlu0 %200, %v37_v14  }
  0x2c   :  { %91 = vperm.xlu1 %201, %v40_v15   ;;  %88 = vperm.xlu0 %200, %v39_v16  }
  0x8b   :  { %v53_v19 = vpop.permute.xlu1 %52  ;;  %v47_v20 = vpop.permute.xlu0 %46 }
  0x8c   :  { %vm93_vm0 = vcmp.eq.s32.totalorder %v47_v20, %v316_v18  ;;  %vm95_vm1 = vcmp.eq.s32.totalorder %v53_v19, %v316_v18 }
  0x8d   :  { %v180_v24 = vsel %vm93_vm0, 1.0, %v248_v23  ;;  %v182_v27 = vsel %vm95_vm1, 1.0, %v248_v23 }
  0x8f   :  { %v56_v21 = vpop.permute.xlu1 %55  ;;  %v50_v22 = vpop.permute.xlu0 %49 }
  0x90   :  { %vm94_vm2 = vcmp.eq.s32.totalorder %v50_v22, %v316_v18  ;;  %vm96_vm3 = vcmp.eq.s32.totalorder %v56_v21, %v316_v18 }
  0x91   :  { %v181_v25 = vsel %vm94_vm2, 1.0, %v248_v23  ;;  %v183_v31 = vsel %vm96_vm3, 1.0, %v248_v23 }
  0x92   :  { %v142_v26 = vadd.f32 %v181_v25, %v180_v24 }
  0x93   :  { %v62_v28 = vpop.permute.xlu1 %61  ;;  %v59_v29 = vpop.permute.xlu0 %58 }
  0x94   :  { %v143_v30 = vadd.f32 %v182_v27, %v142_v26  ;;  %vm97_vm4 = vcmp.eq.s32.totalorder %v59_v29, %v316_v18  ;;  %vm98_vm5 = vcmp.eq.s32.totalorder %v62_v28, %v316_v18 }
  0x95   :  { %v184_v33 = vsel %vm97_vm4, 1.0, %v248_v23  ;;  %v185_v37 = vsel %vm98_vm5, 1.0, %v248_v23 }
  0x96   :  { %v144_v32 = vadd.f32 %v183_v31, %v143_v30 }
  0x97   :  { %v68_v34 = vpop.permute.xlu1 %67  ;;  %v65_v35 = vpop.permute.xlu0 %64 }
  0x98   :  { %v145_v36 = vadd.f32 %v184_v33, %v144_v32  ;;  %vm99_vm6 = vcmp.eq.s32.totalorder %v65_v35, %v316_v18  ;;  %vm100_vm7 = vcmp.eq.s32.totalorder %v68_v34, %v316_v18 }
  0x99   :  { %v186_v39 = vsel %vm99_vm6, 1.0, %v248_v23  ;;  %v187_v43 = vsel %vm100_vm7, 1.0, %v248_v23 }
  0x9a   :  { %v146_v38 = vadd.f32 %v185_v37, %v145_v36 }
  0x9b   :  { %v74_v40 = vpop.permute.xlu1 %73  ;;  %v71_v41 = vpop.permute.xlu0 %70 }
  0x9c   :  { %v147_v42 = vadd.f32 %v186_v39, %v146_v38  ;;  %vm101_vm8 = vcmp.eq.s32.totalorder %v71_v41, %v316_v18  ;;  %vm102_vm9 = vcmp.eq.s32.totalorder %v74_v40, %v316_v18 }
  0x9d   :  { %v188_v45 = vsel %vm101_vm8, 1.0, %v248_v23  ;;  %v189_v49 = vsel %vm102_vm9, 1.0, %v248_v23 }
  0x9e   :  { %v148_v44 = vadd.f32 %v187_v43, %v147_v42 }
  0x9f   :  { %v80_v46 = vpop.permute.xlu1 %79  ;;  %v77_v47 = vpop.permute.xlu0 %76 }
  0xa0   :  { %v149_v48 = vadd.f32 %v188_v45, %v148_v44  ;;  %vm103_vm10 = vcmp.eq.s32.totalorder %v77_v47, %v316_v18  ;;  %vm104_vm11 = vcmp.eq.s32.totalorder %v80_v46, %v316_v18 }
  0xa1   :  { %v190_v51 = vsel %vm103_vm10, 1.0, %v248_v23  ;;  %v191_v55 = vsel %vm104_vm11, 1.0, %v248_v23 }
  0xa2   :  { %v150_v50 = vadd.f32 %v189_v49, %v149_v48 }
  0xa3   :  { %v86_v52 = vpop.permute.xlu1 %85  ;;  %v83_v53 = vpop.permute.xlu0 %82 }
  0xa4   :  { %v151_v54 = vadd.f32 %v190_v51, %v150_v50  ;;  %vm105_vm12 = vcmp.eq.s32.totalorder %v83_v53, %v316_v18  ;;  %vm106_vm13 = vcmp.eq.s32.totalorder %v86_v52, %v316_v18 }
  0xa5   :  { %v192_v57 = vsel %vm105_vm12, 1.0, %v248_v23  ;;  %v193_v61 = vsel %vm106_vm13, 1.0, %v248_v23 }
  0xa6   :  { %v152_v56 = vadd.f32 %v191_v55, %v151_v54 }
  0xa7   :  { %v92_v58 = vpop.permute.xlu1 %91  ;;  %v89_v59 = vpop.permute.xlu0 %88 }
  0xa8   :  { %v153_v60 = vadd.f32 %v192_v57, %v152_v56  ;;  %vm107_vm14 = vcmp.eq.s32.totalorder %v89_v59, %v316_v18  ;;  %vm108_vm15 = vcmp.eq.s32.totalorder %v92_v58, %v316_v18 }
  0xa9   :  { %v194_v63 = vsel %vm107_vm14, 1.0, %v248_v23  ;;  %v195_v1 = vsel %vm108_vm15, 1.0, %v248_v23 }
  0xaa   :  { %v154_v62 = vadd.f32 %v193_v61, %v153_v60 }
  0xac   :  { %v155_v0 = vadd.f32 %v194_v63, %v154_v62 }
  0xae   :  { %v156_v2 = vadd.f32 %v195_v1, %v155_v0 }
  0xb0   :  { %v157_v3 = vrot.slane %v156_v2, 4 }
  0xb2   :  { %v158_v4 = vadd.f32 %v157_v3, %v156_v2 }
  0xb4   :  { %v159_v5 = vrot.slane %v158_v4, 2 }
  0xb6   :  { %v160_v6 = vadd.f32 %v159_v5, %v158_v4 }
  0xb8   :  { %v161_v7 = vrot.slane %v160_v6, 1 }
  0xba   :  { %v162_v9 = vadd.f32 %v161_v7, %v160_v6 }
  0xbc   :  { %v163_v10 = vadd.f32 %v162_v9, %v141_v8 }
  0xbe   :  { %164 = vst [vmem:[#allocation5] sm:$0x1] %v163_v10 }
  0xbf   :  { %233 = shalt.err (!%p230_p9)
}
  0xc0   :  { %174 = dma.vmem_to_hbm [thread:$0]  %s172_s18, 16, %s339_s2, [#allocation4]  }
  0xc1   :  { %244 = dma.done.wait [#allocation4], 16  }
  0xc2   :  { %245 = vsyncadd [#allocation4], 4294967280 }
  0xc3   :  { %178 = vsyncpa [#allocation3], 1 }
  0xc4   :  { %179 = vsyncpa [#allocation4], 1 }

</bundles_post_ra>
